<compile_context>
chip_gen: v5e
topology: v5e:2x2
jax: 0.10.0
libtpu: 0.0.40
codegen_flags: <defaults>
</compile_context>

<pallas_src>
import functools

import jax
import jax.numpy as jnp
from jax import lax
from jax.experimental import pallas as pl
from jax.experimental.pallas import tpu as pltpu

# --- small, module-consistent shapes ----------------------------------------
BS = 2              # batch size
NJOINTS = 4
NFEATS = 4
NFRAMES = 16        # sequence length
INPUT_FEATS = NJOINTS * NFEATS     # 16
LATENT_DIM = 128    # 128-multiple so every output store is lane-dense (real model: 256)

# dot_general dimension numbers for  y = x^T @ W  with x: (C, F), W: (C, L) -> (F, L).
# The contraction runs over the joints*feats axis; the MXU consumes the LHS in
# transposed order, so no explicit relayout of x is ever materialized.
_TN = (((0,), (0,)), ((), ()))


def _embed_all_frames(x_cf, w_ref, b_ref):
    """x_cf: (C, nframes) value; returns (nframes, L) = x_cf^T @ W + b."""
    y = lax.dot_general(x_cf, w_ref[...], dimension_numbers=_TN,
                        preferred_element_type=jnp.float32)
    return y + b_ref[...]                       # (1, L) broadcasts over frames


def _pose_only_kernel(x_ref, wp_ref, bp_ref, o_ref):
    # x_ref: (C, nframes)   wp_ref: (C, L)   bp_ref: (1, L)   o_ref: (nframes, L)
    o_ref[...] = _embed_all_frames(x_ref[...], wp_ref, bp_ref)


def _rot_vel_kernel(x_ref, wv_ref, bv_ref, wp_ref, bp_ref, o_ref):
    # One vel matmul for ALL frames (single MXU push), then overwrite frame 0
    # with the tiny poseEmbedding fix-up.  No fused 2L weight, no iota/select.
    x = x_ref[...]                               # (C, nframes)
    o_ref[...] = _embed_all_frames(x, wv_ref, bv_ref)
    x0 = x[:, 0:1]                               # (C, 1) static slice: frame 0
    y0 = lax.dot_general(x0, wp_ref[...], dimension_numbers=_TN,
                         preferred_element_type=jnp.float32)   # (1, L)
    o_ref[0:1, :] = y0 + bp_ref[...]


@functools.partial(jax.jit, static_argnames="data_rep")
def input_process(x_bjfn, params, data_rep):
    """x_bjfn: (bs, njoints, nfeats, nframes) f32 — PyTorch module input layout.

    Returns (nframes, bs, latent_dim) f32 — same as the PyTorch module.
    """
    bs, nj, nf, nframes = x_bjfn.shape
    c = nj * nf
    wp, bp, wv, bv = params                      # weights already [in, out] = (C, L)
    latent = wp.shape[1]

    # Free reshape only (merge the two contiguous middle dims) — no HBM pass.
    x = x_bjfn.reshape(bs, c, nframes)

    x_spec = pl.BlockSpec((None, c, nframes), lambda b: (b, 0, 0))   # (C, NF) per batch
    w_spec = pl.BlockSpec((c, latent), lambda b: (0, 0))             # resident weights
    b_spec = pl.BlockSpec((1, latent), lambda b: (0, 0))
    out_spec = pl.BlockSpec((nframes, latent), lambda b: (0, b))     # 128-aligned cols

    if data_rep in ("rot6d", "xyz", "hml_vec"):
        kernel = _pose_only_kernel
        operands = (x, wp, bp)
        in_specs = [x_spec, w_spec, b_spec]
    elif data_rep == "rot_vel":
        kernel = _rot_vel_kernel
        operands = (x, wv, bv, wp, bp)
        in_specs = [x_spec, w_spec, b_spec, w_spec, b_spec]
    else:
        raise ValueError(data_rep)

    y2d = pl.pallas_call(
        kernel,
        out_shape=jax.ShapeDtypeStruct((nframes, bs * latent), jnp.float32),
        grid=(bs,),
        in_specs=in_specs,
        out_specs=out_spec,
        compiler_params=pltpu.CompilerParams(
            dimension_semantics=("parallel",)),   # independent batch steps -> 2 TCs on v7x
    )(*operands)

    # (nframes, bs*latent) -> (nframes, bs, latent): free, layout-preserving view.
    return y2d.reshape(nframes, bs, latent)


def reference(x_bjfn, params, data_rep):
    """Pure-JAX reference mirroring the PyTorch forward exactly (f32-accurate)."""
    bs, nj, nf, nframes = x_bjfn.shape
    wp, bp, wv, bv = params
    x = jnp.transpose(x_bjfn, (3, 0, 1, 2)).reshape(nframes, bs, nj * nf)
    hi = lax.Precision.HIGHEST
    pose = jnp.einsum("fbc,cl->fbl", x, wp, precision=hi) + bp[0]
    if data_rep in ("rot6d", "xyz", "hml_vec"):
        return pose
    elif data_rep == "rot_vel":
        vel = jnp.einsum("fbc,cl->fbl", x[1:], wv, precision=hi) + bv[0]
        return jnp.concatenate([pose[:1], vel], axis=0)
    else:
        raise ValueError(data_rep)


def init_params(key):
    """Deterministic synthetic parameters (PyTorch [out,in] weights stored as [in,out])."""
    ks = jax.random.split(key, 4)
    scale = 1.0 / jnp.sqrt(INPUT_FEATS)
    wp = scale * jax.random.normal(ks[0], (INPUT_FEATS, LATENT_DIM), jnp.float32)
    bp = scale * jax.random.normal(ks[1], (1, LATENT_DIM), jnp.float32)
    wv = scale * jax.random.normal(ks[2], (INPUT_FEATS, LATENT_DIM), jnp.float32)
    bv = scale * jax.random.normal(ks[3], (1, LATENT_DIM), jnp.float32)
    return (wp, bp, wv, bv)


if __name__ == "__main__":
    key = jax.random.PRNGKey(0)
    kx, kp = jax.random.split(key)
    x = jax.random.normal(kx, (BS, NJOINTS, NFEATS, NFRAMES), jnp.float32)
    params = init_params(kp)

    for data_rep in ("hml_vec", "rot_vel"):
        y = jax.block_until_ready(input_process(x, params, data_rep))
        y_ref = reference(x, params, data_rep)
        assert y.shape == (NFRAMES, BS, LATENT_DIM), y.shape
        err = float(jnp.max(jnp.abs(y - y_ref)))
        assert jnp.allclose(y, y_ref, atol=1e-4, rtol=1e-4), \
            f"data_rep={data_rep}: max abs err = {err}"

    print("KERNEL_OK")
</pallas_src>

<mosaic_0001>
module attributes {stable_mosaic.version = 11 : i64} {
  func.func @_pose_only_kernel(%arg0: i32, %arg1: memref<1x16x16xf32, #tpu.memory_space<vmem>>, %arg2: memref<16x128xf32, #tpu.memory_space<vmem>>, %arg3: memref<1x128xf32, #tpu.memory_space<vmem>>, %arg4: memref<16x128xf32, #tpu.memory_space<vmem>>) attributes {dimension_semantics = [#tpu.dimension_semantics<parallel>], iteration_bounds = array<i64: 2>, scalar_prefetch = 0 : i64, scratch_operands = 0 : i64, tpu.core_type = #tpu.core_type<tc>, window_params = [{transform_indices = @transform_0, window_bounds = array<i64: 1, 16, 16>}, {pipeline_mode = #tpu.pipeline_mode<synchronous>, transform_indices = @transform_1, window_bounds = array<i64: 16, 128>}, {pipeline_mode = #tpu.pipeline_mode<synchronous>, transform_indices = @transform_2, window_bounds = array<i64: 1, 128>}, {transform_indices = @transform_3, window_bounds = array<i64: 16, 128>}]} {
    %c0 = arith.constant 0 : index
    %c0_0 = arith.constant 0 : index
    %c0_1 = arith.constant 0 : index
    %0 = vector.load %arg1[%c0, %c0_0, %c0_1] : memref<1x16x16xf32, #tpu.memory_space<vmem>>, vector<1x16x16xf32>
    %1 = vector.shape_cast %0 : vector<1x16x16xf32> to vector<16x16xf32>
    %c0_2 = arith.constant 0 : index
    %c0_3 = arith.constant 0 : index
    %2 = vector.load %arg2[%c0_2, %c0_3] : memref<16x128xf32, #tpu.memory_space<vmem>>, vector<16x128xf32>
    %cst = arith.constant dense<0.000000e+00> : vector<16x128xf32>
    %3 = tpu.matmul %1, %2, %cst {dimension_numbers = #tpu.dot_dimension_numbers<[0], [0], [1], [1], [0, 1, 1, 1], [], []>} : vector<16x16xf32>, vector<16x128xf32>, vector<16x128xf32> -> vector<16x128xf32>
    %c0_4 = arith.constant 0 : index
    %c0_5 = arith.constant 0 : index
    %4 = vector.load %arg3[%c0_4, %c0_5] : memref<1x128xf32, #tpu.memory_space<vmem>>, vector<1x128xf32>
    %5 = vector.broadcast %4 : vector<1x128xf32> to vector<16x128xf32>
    %6 = arith.addf %3, %5 : vector<16x128xf32>
    %c0_6 = arith.constant 0 : index
    %c0_7 = arith.constant 0 : index
    %7 = vector.load %arg4[%c0_6, %c0_7] : memref<16x128xf32, #tpu.memory_space<vmem>>, vector<16x128xf32>
    tpu.vector_store %arg4[%c0_6, %c0_7], %6 {strides = array<i32>} : memref<16x128xf32, #tpu.memory_space<vmem>>, vector<16x128xf32>,
    return
  }
  func.func @transform_0(%arg0: i32) -> (i32, i32, i32) {
    %c0_i32 = arith.constant 0 : i32
    %c0_i32_0 = arith.constant 0 : i32
    %c0_i32_1 = arith.constant 0 : i32
    return %arg0, %c0_i32, %c0_i32_0 : i32, i32, i32
  }
  func.func @transform_1(%arg0: i32) -> (i32, i32) {
    %c0_i32 = arith.constant 0 : i32
    %c0_i32_0 = arith.constant 0 : i32
    %c0_i32_1 = arith.constant 0 : i32
    return %c0_i32, %c0_i32_0 : i32, i32
  }
  func.func @transform_2(%arg0: i32) -> (i32, i32) {
    %c0_i32 = arith.constant 0 : i32
    %c0_i32_0 = arith.constant 0 : i32
    %c0_i32_1 = arith.constant 0 : i32
    return %c0_i32, %c0_i32_0 : i32, i32
  }
  func.func @transform_3(%arg0: i32) -> (i32, i32) {
    %c0_i32 = arith.constant 0 : i32
    %c0_i32_0 = arith.constant 0 : i32
    return %c0_i32, %arg0 : i32, i32
  }
}

</mosaic_0001>

<bundles_post_ra>
// kernel: input_process.1
= control target key start
LH: loop header
LB: loop body
LE: loop exit
PB: predicated region body
PF: predicated region fallthrough
CT: control target
= control target key end

     0   :  { %8 = vsyncpa [#allocation3], 0  ;;  %s711_s0 = inlined_call_operand.hbm [shape: f32[2,16,16], index: 0, kind: input, shape index: {}]   ;;  %s712_s1 = inlined_call_operand.hbm [shape: f32[16,128], index: 1, kind: input, shape index: {}]   ;;  %s713_s2 = inlined_call_operand.vmem [shape: f32[1,128], index: 2, kind: input, shape index: {}]   ;;  %s714_s3 = inlined_call_operand.vmem [shape: f32[16,256], index: 3, kind: output, shape index: {}]  }
   0x1   :  { %10 = vsyncpa [#allocation3 + $0x1], 0 }
   0x2   :  { %11 = vsyncpa [#allocation5], 0  ;;  %s591_s12 = smov 0   ;;  %s593_s13 = smov 0  }
   0x3   :  { %s595_s14 = smov 0   ;;  %s597_s15 = smov 0  }
   0x4 LB: > { %s610_s16 = sadd.s32 4294967295, %s566_s15   ;;  %p37_p0 = scmp.ne.s32.totalorder %s558_s13, %s554_s12  ;;  %s566_s15 = sphi %s597_s15, %s722_s15   ;;  %s562_s14 = sphi %s595_s14, %s721_s14   ;;  %s558_s13 = sphi %s593_s13, %s720_s13   ;;  %s554_s12 = sphi %s591_s12, %s719_s12  }
   0x5   : > { %p38_p1 = scmp.eq.s32.totalorder %s610_s16, 0  ;;  %p103_p2 = scmp.eq.s32.totalorder %s610_s16, 1 }
   0x6   : > { %p395_p3 = scmp.ge.s32.totalorder %s566_s15, 1  ;;  %p116_p4 = scmp.lt.s32.totalorder %s566_s15, 3 }
   0x7   : > { %p619_p5 = por %p38_p1, %p37_p0  ;;  %s127_s21 = sshll.u32 %s712_s1, 4  ;;  %s128_s21 = int_to_ptr.hbm [resolvable:$true] %s127_s21 }
   0x8   : > { %p623_p6 = pnand %p395_p3, %p116_p4  ;;  %s568_s22 = smov [#allocation4]  }
   0x9   : > { %s129_s23 = sshll.u32 %s568_s22, 4  ;;  %s569_s24 = smov 128   ;;  %s130_s23 = int_to_ptr.vmem [resolvable:$true] %s129_s23 }
   0xa   : > { %p420_p7 = pneg %p623_p6  ;;  %s570_s25 = smov 8  }
   0xb   : > { %s638_s26 = sadd.s32 1, %s566_s15   ;;  %s24_s27 = sadd.s32 1, %s562_s14 }
   0xc   : > { %p421_p8 = pnand %p420_p7, %p38_p1  ;;  %s21_s28 = ssub.s32 %s566_s15, %s638_s26 }
   0xd   : > { %p31_p9 = scmp.ne.s32.totalorder %s562_s14, %s558_s13  ;;  %p22_p10 = scmp.eq.s32.totalorder %s21_s28, 0 }
   0xe   : > { %423 = dma.hbm_to_vmem [thread:$0]  (!%p421_p8), %s128_s21, 256, %s130_s23, [#allocation5], %s569_s24, %s569_s24, %s570_s25  }
   0xf   : > { %p32_p11 = scmp.eq.s32.totalorder %s566_s15, 0  ;;  %p648_p12 = por %p103_p2, %p31_p9 }
  0x10   : > { %p429_p13 = scmp.lt.s32.totalorder %s566_s15, 2  ;;  %s146_s4 = sand.u32 1, %s562_s14  }
  0x11   : > { %s654_s30 = scalar_select %p22_p10, %s562_s14, %s24_s27  }
  0x12   : > { %p33_p0 = por %p32_p11, %p31_p9  ;;  %s398_s5 = sshll.u32 %s146_s4, 4 }
  0x13   : > { %s411_s6 = sshll.u32 %s566_s15, 4  ;;  %s150_s10 = scalar_lea.vmem [#allocation2], %s398_s5 }
  0x14   : > { %s155_s9 = scalar_lea.hbm %s711_s0, %s411_s6  ;;  %s158_s11 = sshll.u32 %s150_s10, 4  ;;  %s159_s11 = int_to_ptr.vmem [resolvable:$true] %s158_s11 }
  0x15   : > { %s156_s12 = sshll.u32 %s155_s9, 4  ;;  %p661_p2 = pnand %p429_p13, %p33_p0  ;;  %s157_s12 = int_to_ptr.hbm [resolvable:$true] %s156_s12 }
  0x16   : > { %s147_s20 = scalar_lea.sflag [#allocation3], %s146_s4  ;;  %s498_s21 = sshra.s32 %s157_s12, 4  ;;  %s499_s21 = int_to_ptr.hbm [resolvable:$true] %s498_s21 }
  0x17   : > { %s500_s22 = scalar_lea.hbm %s499_s21, 16  ;;  %p502_p4 = pneg %p661_p2 }
  0x18   : > { %p501_p3 = scmp.ne.s32.totalorder %s499_s21, %s500_s22  ;;  %s505_s27 = scalar_lea.hbm %s711_s0, 32 }
  0x19   : > { %p506_p9 = scmp.lt.s32.totalorder %s499_s21, %s711_s0  ;;  %p507_p10 = scmp.lt.s32.totalorder %s505_s27, %s500_s22 }
  0x1a   : > { %p503_p7 = pnand %p502_p4, %p501_p3 }
  0x1b   : > { %p508_p11 = por %p507_p10, %p506_p9 }
  0x1c   : > { %p504_p8 = pneg %p503_p7 }
  0x1e   : > { %p509_p13 = pnand %p508_p11, %p504_p8 }
  0x20   : > { %512 = shalt.err (!%p509_p13)
}
  0x21   : > { %427 = dma.hbm_to_vmem [thread:$0]  (!%p661_p2), %s157_s12, 256, %s159_s11, %s147_s20, %s569_s24, %s569_s24, %s570_s25  }
  0x22   : > { %170 = sbr.rel (%p623_p6) target bundleno = 353 (0x161), region = 32  ;;  %s172_s4 = sand.u32 (!%p623_p6), 1, %s558_s13  }
  0x23   : > { %s402_s6 = sshll.u32 (!%p623_p6), %s172_s4, 4  ;;  %s173_s7 = scalar_lea.sflag (!%p623_p6), [#allocation3], %s172_s4 }
  0x24   : > { %s176_s8 = scalar_lea.vmem (!%p623_p6), [#allocation2], %s402_s6 }
  0x27   : > { %545 = dma.done.wait (%p619_p5), %s173_s7, 256  }
  0x28   : > { %547 = vsyncadd (%p619_p5), %s173_s7, 4294967040 }
  0x29   : > { %549 = dma.done.wait (%p38_p1), [#allocation5], 256  }
  0x2a   : > { %551 = vsyncadd (%p38_p1), [#allocation5], 4294967040  ;;  %v204_v0 = vld [vmem:[%s176_s8] sm:$0xff]  ;;  %v207_v1 = vld [vmem:[#allocation4 + $0x8] sm:$0xff]  ;;  %vm244_vm0 = vcmask 130048   ;;  %s203_s24 = scalar_lea.vmem [#allocation6], %s402_s6 }
  0x2b   : > { %212 = vxpose.xlu0.b32.start [1/2] (short) (narrow) %v204_v0, 16  ;;  %265 = vmatpush.msra.mxu0 %v207_v1  ;;  %v206_v2 = vld [vmem:[#allocation4] sm:$0xff]  ;;  %v205_v3 = vld [vmem:[%s176_s8 + $0x8] sm:$0xff]  ;;  %s408_s25 = sshll.u32 (%p648_p12), %s610_s16, 3 }
  0x2c   : > { %412 = vmatpush.msra.mxu1 %v207_v1  ;;  %v467_v6 = vld [vmem:[%s713_s2] ss:$0 sm:$0xff]  ;;  %s284_s11 = scalar_lea.vmem (%p648_p12), %s714_s3, %s408_s25 }
  0x2d   : > { %266 = vmatpush.msra.mxu0 %v206_v2 }
  0x2e   : > { %413 = vmatpush.msra.mxu1 %v206_v2 }
  0x33   : > { %213 = vxpose.xlu0.b32.end [2/2] (short) (narrow) %v205_v3, 16 }
  0xcf   : > { %v228_v4 = vpop.trf.xlu0 }
  0xd0   : > { %405 = vmatmul.msk.f32.vlgmr.msra.gmra.mxu0 %vm244_vm0, %v228_v4 }
  0xd7   : > { %v229_v5 = vpop.trf.xlu0 }
  0xd8   : > { %406 = vmatmul.msk.f32.vlgmr.msra.gmra.mxu1 %vm244_vm0, %v229_v5 }
 0x14d   : > { %v268_v7 = vpop.f32.mrf.mxu0 }
 0x14e   : > { %v269_v8 = vadd.f32 %v467_v6, %v268_v7 }
 0x150   : > { %274 = vst [vmem:[%s203_s24] sm:$0xff] %v269_v8 }
 0x154   : > { %282 = sbr.rel (!%p648_p12) target bundleno = 353 (0x161), region = 44 }
 0x155   : > { %v271_v9 = vpop.f32.mrf.mxu1 }
 0x156   : > { %v272_v10 = vadd.f32 %v467_v6, %v271_v9 }
 0x157   : > { %v315_v11 = vld [vmem:[%s203_s24] sm:$0xff] (%p648_p12) }
 0x158   : > { %275 = vst [vmem:[%s203_s24 + $0x8] sm:$0xff] %v272_v10 }
 0x159   : > { %316 = vst [vmem:[%s284_s11] sm:$0xff] %v315_v11 }
 0x15f   : > { %v317_v12 = vld [vmem:[%s203_s24 + $0x8] sm:$0xff] }
 0x160   : > { %318 = vst [vmem:[%s284_s11 + $0x10] sm:$0xff] %v317_v12 }
 0x161 PF: > { %p14_p1 = scmp.ge.s32.totalorder %s638_s26, 4   ;;  %s719_s12 = smov %s558_s13 }
 0x162   : > { %s720_s13 = smov %s562_s14  ;;  %s721_s14 = smov %s654_s30 }
 0x163   : > { %s722_s15 = smov %s638_s26  ;;  %16 = sbr.rel (!%p14_p1) target bundleno = 4 (0x4), region = 114 }
 0x168   :  { %334 = vsyncpa [#allocation3], 1 }
 0x169   :  { %336 = vsyncpa [#allocation3 + $0x1], 1 }
 0x16a   :  { %337 = vsyncpa [#allocation5], 1 }

</bundles_post_ra>
